<compile_context>
chip_gen: v5e
topology: v5e:2x2
jax: 0.10.0
libtpu: 0.0.40
codegen_flags: <defaults>
</compile_context>

<pallas_src>
import functools

import jax
import jax.numpy as jnp
from jax.experimental import pallas as pl
from jax.experimental.pallas import tpu as pltpu


def _ce_seg_kernel(pred_ref, tgt_ref, wgt_ref, loss_ref, wsum_ref, *,
                   ignore_index, hw):
    """One (batch b, pixel-tile p) grid step.

    pred_ref : (1, C, T) logits tile   (classes on sublanes, pixels on lanes)
    tgt_ref  : (1, 1, T) int32 targets (lane-dense)
    wgt_ref  : (1, C)    f32 class weights (resident across the grid)
    loss_ref / wsum_ref : (1, 1, T) f32 lane-wise accumulators for batch b
    """
    p = pl.program_id(1)

    # Zero the per-batch accumulators at the first pixel tile of each batch.
    @pl.when(p == 0)
    def _():
        loss_ref[...] = jnp.zeros_like(loss_ref)
        wsum_ref[...] = jnp.zeros_like(wsum_ref)

    logits = pred_ref[0].astype(jnp.float32)            # (C, T)
    tgt = tgt_ref[0]                                    # (1, T) int32
    C, T = logits.shape

    # Pixel validity: inside the (possibly ragged) image and not ignore_index.
    lane = jax.lax.broadcasted_iota(jnp.int32, (1, T), 1)
    valid = jnp.logical_and(p * T + lane < hw, tgt != ignore_index)   # (1, T)

    # Numerically stable log-sum-exp along the class (sublane) axis.
    m = jnp.max(logits, axis=0, keepdims=True)          # (1, T)
    e = jnp.exp(logits - m)                             # (C, T)

    # One-hot of the target class along the sublane axis (targets >= C that are
    # not ignore_index match no row and contribute 0 loss / 0 weight).
    cls = jax.lax.broadcasted_iota(jnp.int32, (C, T), 0)
    onehot = (cls == tgt).astype(jnp.float32)           # (C, T)

    # Class-axis reductions on the MXU: (1, C) @ (C, T) -> (1, T).
    ones_row = jnp.ones((1, C), jnp.float32)
    sumexp = jnp.dot(ones_row, e, preferred_element_type=jnp.float32)
    picked = jnp.dot(ones_row, onehot * logits, preferred_element_type=jnp.float32)
    w = jnp.dot(wgt_ref[...].astype(jnp.float32), onehot,
                preferred_element_type=jnp.float32)

    nll = jnp.log(sumexp) + m - picked                  # (1, T) = -log_softmax[target]

    # Mask with select (not multiply) so garbage lanes in a ragged tail tile can
    # never inject NaN/Inf into the accumulators; wv is reused for both sums.
    wv = jnp.where(valid, w, 0.0)
    nll_safe = jnp.where(valid, nll, 0.0)

    loss_ref[0] += nll_safe * wv
    wsum_ref[0] += wv


def cross_entropy_segmentation_loss(predictions, targets, class_weight=None,
                                    ignore_index=255, tile_hw=2048,
                                    vmem_limit_bytes=32 * 1024 * 1024):
    """predictions: (B, C, H, W) float logits; targets: (B, H, W) int labels."""
    B, C, H, W = predictions.shape
    HW = H * W

    # Free reshapes only — no transpose, no pad, no extra HBM traffic.
    logits = predictions.reshape(B, C, HW)              # keep caller dtype (bf16 ok)
    tgt = targets.reshape(B, 1, HW).astype(jnp.int32)

    if class_weight is None:
        wgt = jnp.ones((1, C), jnp.float32)
    else:
        wgt = jnp.asarray(class_weight, jnp.float32).reshape(1, C)

    # Pixel tile: big & lane-dense.  If the image fits in one tile, use the full
    # row (block == full dim, so it need not be a multiple of 128); otherwise
    # round down to a multiple of 128 and mask the ragged tail in-kernel.
    if HW <= tile_hw:
        tile_hw = HW
    else:
        tile_hw = max(128, (tile_hw // 128) * 128)
    n_pt = pl.cdiv(HW, tile_hw)

    kernel = functools.partial(_ce_seg_kernel, ignore_index=ignore_index, hw=HW)

    loss_part, w_part = pl.pallas_call(
        kernel,
        out_shape=(jax.ShapeDtypeStruct((B, 1, tile_hw), jnp.float32),
                   jax.ShapeDtypeStruct((B, 1, tile_hw), jnp.float32)),
        grid_spec=pltpu.PrefetchScalarGridSpec(
            num_scalar_prefetch=0,
            grid=(B, n_pt),
            in_specs=[
                pl.BlockSpec((1, C, tile_hw), lambda b, p: (b, 0, p)),  # logits
                pl.BlockSpec((1, 1, tile_hw), lambda b, p: (b, 0, p)),  # targets
                pl.BlockSpec((1, C), lambda b, p: (0, 0)),              # class weights
            ],
            out_specs=(
                pl.BlockSpec((1, 1, tile_hw), lambda b, p: (b, 0, 0)),  # loss partials
                pl.BlockSpec((1, 1, tile_hw), lambda b, p: (b, 0, 0)),  # weight partials
            ),
        ),
        compiler_params=pltpu.CompilerParams(
            dimension_semantics=("parallel", "arbitrary"),
            vmem_limit_bytes=vmem_limit_bytes),
    )(logits, tgt, wgt)

    # reduction='mean': divide by the summed weights of non-ignored pixels.
    # NOTE: if every pixel is ignore_index this is 0/0 -> NaN (PyTorch does too).
    return jnp.sum(loss_part) / jnp.sum(w_part)


def _reference_loss(predictions, targets, class_weight=None, ignore_index=255):
    """Pure-JAX reference mirroring nn.CrossEntropyLoss(ignore_index, weight, 'mean')."""
    B, C, H, W = predictions.shape
    logits = jnp.transpose(predictions, (0, 2, 3, 1)).reshape(-1, C).astype(jnp.float32)
    tgt = targets.reshape(-1).astype(jnp.int32)
    if class_weight is None:
        class_weight = jnp.ones((C,), jnp.float32)
    valid = tgt != ignore_index
    t_safe = jnp.where(valid, tgt, 0)
    logp = jax.nn.log_softmax(logits, axis=-1)
    nll = -jnp.take_along_axis(logp, t_safe[:, None], axis=-1)[:, 0]
    w = class_weight[t_safe] * valid.astype(jnp.float32)
    return jnp.sum(nll * w) / jnp.sum(w)


if __name__ == "__main__":
    key = jax.random.PRNGKey(0)
    k1, k2, k3, k4, k5, k6 = jax.random.split(key, 6)

    # Test 1: B=2, C=4, H=W=16, no class weights, single pixel tile.
    B, C, H, W = 2, 4, 16, 16
    predictions = jax.random.normal(k1, (B, C, H, W), dtype=jnp.float32)
    targets = jax.random.randint(k2, (B, H, W), 0, C, dtype=jnp.int32)
    ignore_mask = jax.random.bernoulli(k3, 0.1, (B, H, W))
    targets = jnp.where(ignore_mask, 255, targets)

    loss = jax.block_until_ready(cross_entropy_segmentation_loss(predictions, targets))
    ref = _reference_loss(predictions, targets)
    assert jnp.allclose(loss, ref, rtol=1e-5, atol=1e-5), (loss, ref)

    # Test 2: class weights + ragged pixel tiling (HW=144 with tile_hw=128).
    B2, C2, H2, W2 = 2, 16, 12, 12
    pred2 = jax.random.normal(k4, (B2, C2, H2, W2), dtype=jnp.float32)
    tgt2 = jax.random.randint(k5, (B2, H2, W2), 0, C2, dtype=jnp.int32)
    tgt2 = jnp.where(jax.random.bernoulli(k6, 0.15, (B2, H2, W2)), 255, tgt2)
    cw = 0.5 + jnp.arange(C2, dtype=jnp.float32) / C2

    loss2 = jax.block_until_ready(
        cross_entropy_segmentation_loss(pred2, tgt2, class_weight=cw, tile_hw=128))
    ref2 = _reference_loss(pred2, tgt2, class_weight=cw)
    assert jnp.allclose(loss2, ref2, rtol=1e-5, atol=1e-5), (loss2, ref2)

    print("KERNEL_OK")
</pallas_src>

<mosaic_0001>
module attributes {stable_mosaic.version = 11 : i64} {
  func.func @_ce_seg_kernel(%arg0: i32, %arg1: i32, %arg2: memref<1x4x256xf32, #tpu.memory_space<vmem>>, %arg3: memref<1x1x256xi32, #tpu.memory_space<vmem>>, %arg4: memref<1x4xf32, #tpu.memory_space<vmem>>, %arg5: memref<1x1x256xf32, #tpu.memory_space<vmem>>, %arg6: memref<1x1x256xf32, #tpu.memory_space<vmem>>) attributes {dimension_semantics = [#tpu.dimension_semantics<parallel>, #tpu.dimension_semantics<arbitrary>], iteration_bounds = array<i64: 2, 1>, scalar_prefetch = 0 : i64, scratch_operands = 0 : i64, tpu.core_type = #tpu.core_type<tc>, window_params = [{transform_indices = @transform_0, window_bounds = array<i64: 1, 4, 256>}, {transform_indices = @transform_1, window_bounds = array<i64: 1, 1, 256>}, {pipeline_mode = #tpu.pipeline_mode<synchronous>, transform_indices = @transform_2, window_bounds = array<i64: 1, 4>}, {transform_indices = @transform_3, window_bounds = array<i64: 1, 1, 256>}, {transform_indices = @transform_4, window_bounds = array<i64: 1, 1, 256>}]} {
    %c0_i32 = arith.constant 0 : i32
    %0 = arith.cmpi eq, %arg1, %c0_i32 : i32
    %1 = arith.extui %0 : i1 to i32
    %c0_i32_0 = arith.constant 0 : i32
    %2 = arith.cmpi ne, %1, %c0_i32_0 : i32
    scf.if %2 {
      %cst_27 = arith.constant 0.000000e+00 : f32
      %52 = vector.broadcast %cst_27 : f32 to vector<1x1x256xf32>
      %c0_28 = arith.constant 0 : index
      %c0_29 = arith.constant 0 : index
      %c0_30 = arith.constant 0 : index
      %53 = vector.load %arg5[%c0_28, %c0_29, %c0_30] : memref<1x1x256xf32, #tpu.memory_space<vmem>>, vector<1x1x256xf32>
      tpu.vector_store %arg5[%c0_28, %c0_29, %c0_30], %52 {strides = array<i32>} : memref<1x1x256xf32, #tpu.memory_space<vmem>>, vector<1x1x256xf32>,
      %cst_31 = arith.constant 0.000000e+00 : f32
      %54 = vector.broadcast %cst_31 : f32 to vector<1x1x256xf32>
      %c0_32 = arith.constant 0 : index
      %c0_33 = arith.constant 0 : index
      %c0_34 = arith.constant 0 : index
      %55 = vector.load %arg6[%c0_32, %c0_33, %c0_34] : memref<1x1x256xf32, #tpu.memory_space<vmem>>, vector<1x1x256xf32>
      tpu.vector_store %arg6[%c0_32, %c0_33, %c0_34], %54 {strides = array<i32>} : memref<1x1x256xf32, #tpu.memory_space<vmem>>, vector<1x1x256xf32>,
    } else {
    }
    %c0 = arith.constant 0 : index
    %c0_1 = arith.constant 0 : index
    %c0_2 = arith.constant 0 : index
    %3 = vector.load %arg2[%c0, %c0_1, %c0_2] : memref<1x4x256xf32, #tpu.memory_space<vmem>>, vector<1x4x256xf32>
    %4 = vector.shape_cast %3 : vector<1x4x256xf32> to vector<4x256xf32>
    %c0_3 = arith.constant 0 : index
    %c0_4 = arith.constant 0 : index
    %c0_5 = arith.constant 0 : index
    %5 = vector.load %arg3[%c0_3, %c0_4, %c0_5] : memref<1x1x256xi32, #tpu.memory_space<vmem>>, vector<1x1x256xi32>
    %6 = vector.shape_cast %5 : vector<1x1x256xi32> to vector<1x256xi32>
    %7 = tpu.iota {dimensions = array<i32: 1>} : vector<1x256xi32>
    %c256_i32 = arith.constant 256 : i32
    %8 = arith.muli %arg1, %c256_i32 : i32
    %9 = vector.broadcast %8 : i32 to vector<1x256xi32>
    %10 = arith.addi %9, %7 : vector<1x256xi32>
    %c256_i32_6 = arith.constant 256 : i32
    %11 = vector.broadcast %c256_i32_6 : i32 to vector<1x256xi32>
    %12 = arith.cmpi slt, %10, %11 : vector<1x256xi32>
    %c255_i32 = arith.constant 255 : i32
    %13 = vector.broadcast %c255_i32 : i32 to vector<1x256xi32>
    %14 = arith.cmpi ne, %6, %13 : vector<1x256xi32>
    %15 = arith.andi %12, %14 : vector<1x256xi1>
    %cst = arith.constant dense<0xFF800000> : vector<256xf32>
    %16 = vector.multi_reduction <maximumf>, %4, %cst [0] : vector<4x256xf32> to vector<256xf32>
    %17 = vector.shape_cast %16 : vector<256xf32> to vector<1x256xf32>
    %18 = vector.broadcast %17 : vector<1x256xf32> to vector<4x256xf32>
    %19 = arith.subf %4, %18 : vector<4x256xf32>
    %20 = math.exp %19 : vector<4x256xf32>
    %21 = tpu.iota {dimensions = array<i32: 0>} : vector<4x256xi32>
    %22 = vector.broadcast %6 : vector<1x256xi32> to vector<4x256xi32>
    %23 = arith.cmpi eq, %21, %22 : vector<4x256xi32>
    %24 = arith.extui %23 : vector<4x256xi1> to vector<4x256xi32>
    %25 = arith.sitofp %24 : vector<4x256xi32> to vector<4x256xf32>
    %cst_7 = arith.constant 1.000000e+00 : f32
    %26 = vector.broadcast %cst_7 : f32 to vector<1x4xf32>
    %cst_8 = arith.constant dense<0.000000e+00> : vector<1x256xf32>
    %27 = tpu.matmul %26, %20, %cst_8 {dimension_numbers = #tpu.dot_dimension_numbers<[1], [0], [0], [1], [0, 0, 1, 1], [], []>} : vector<1x4xf32>, vector<4x256xf32>, vector<1x256xf32> -> vector<1x256xf32>
    %28 = arith.mulf %25, %4 : vector<4x256xf32>
    %cst_9 = arith.constant dense<0.000000e+00> : vector<1x256xf32>
    %29 = tpu.matmul %26, %28, %cst_9 {dimension_numbers = #tpu.dot_dimension_numbers<[1], [0], [0], [1], [0, 0, 1, 1], [], []>} : vector<1x4xf32>, vector<4x256xf32>, vector<1x256xf32> -> vector<1x256xf32>
    %c0_10 = arith.constant 0 : index
    %c0_11 = arith.constant 0 : index
    %30 = vector.load %arg4[%c0_10, %c0_11] : memref<1x4xf32, #tpu.memory_space<vmem>>, vector<1x4xf32>
    %cst_12 = arith.constant dense<0.000000e+00> : vector<1x256xf32>
    %31 = tpu.matmul %30, %25, %cst_12 {dimension_numbers = #tpu.dot_dimension_numbers<[1], [0], [0], [1], [0, 0, 1, 1], [], []>} : vector<1x4xf32>, vector<4x256xf32>, vector<1x256xf32> -> vector<1x256xf32>
    %32 = math.log %27 : vector<1x256xf32>
    %33 = arith.addf %32, %17 : vector<1x256xf32>
    %34 = arith.subf %33, %29 : vector<1x256xf32>
    %cst_13 = arith.constant 0.000000e+00 : f32
    %35 = vector.broadcast %cst_13 : f32 to vector<1x256xf32>
    %36 = arith.select %15, %31, %35 : vector<1x256xi1>, vector<1x256xf32>
    %cst_14 = arith.constant 0.000000e+00 : f32
    %37 = vector.broadcast %cst_14 : f32 to vector<1x256xf32>
    %38 = arith.select %15, %34, %37 : vector<1x256xi1>, vector<1x256xf32>
    %c0_15 = arith.constant 0 : index
    %c0_16 = arith.constant 0 : index
    %c0_17 = arith.constant 0 : index
    %39 = vector.load %arg5[%c0_15, %c0_16, %c0_17] : memref<1x1x256xf32, #tpu.memory_space<vmem>>, vector<1x1x256xf32>
    %40 = vector.shape_cast %39 : vector<1x1x256xf32> to vector<1x256xf32>
    %41 = arith.mulf %38, %36 : vector<1x256xf32>
    %42 = arith.addf %40, %41 : vector<1x256xf32>
    %c0_18 = arith.constant 0 : index
    %c0_19 = arith.constant 0 : index
    %c0_20 = arith.constant 0 : index
    %43 = vector.load %arg5[%c0_18, %c0_19, %c0_20] : memref<1x1x256xf32, #tpu.memory_space<vmem>>, vector<1x1x256xf32>
    %44 = vector.shape_cast %43 : vector<1x1x256xf32> to vector<1x256xf32>
    %45 = vector.shape_cast %42 : vector<1x256xf32> to vector<1x1x256xf32>
    tpu.vector_store %arg5[%c0_18, %c0_19, %c0_20], %45 {strides = array<i32>} : memref<1x1x256xf32, #tpu.memory_space<vmem>>, vector<1x1x256xf32>,
    %c0_21 = arith.constant 0 : index
    %c0_22 = arith.constant 0 : index
    %c0_23 = arith.constant 0 : index
    %46 = vector.load %arg6[%c0_21, %c0_22, %c0_23] : memref<1x1x256xf32, #tpu.memory_space<vmem>>, vector<1x1x256xf32>
    %47 = vector.shape_cast %46 : vector<1x1x256xf32> to vector<1x256xf32>
    %48 = arith.addf %47, %36 : vector<1x256xf32>
    %c0_24 = arith.constant 0 : index
    %c0_25 = arith.constant 0 : index
    %c0_26 = arith.constant 0 : index
    %49 = vector.load %arg6[%c0_24, %c0_25, %c0_26] : memref<1x1x256xf32, #tpu.memory_space<vmem>>, vector<1x1x256xf32>
    %50 = vector.shape_cast %49 : vector<1x1x256xf32> to vector<1x256xf32>
    %51 = vector.shape_cast %48 : vector<1x256xf32> to vector<1x1x256xf32>
    tpu.vector_store %arg6[%c0_24, %c0_25, %c0_26], %51 {strides = array<i32>} : memref<1x1x256xf32, #tpu.memory_space<vmem>>, vector<1x1x256xf32>,
    return
  }
  func.func @transform_0(%arg0: i32, %arg1: i32) -> (i32, i32, i32) {
    %c0_i32 = arith.constant 0 : i32
    %c0_i32_0 = arith.constant 0 : i32
    return %arg0, %c0_i32, %arg1 : i32, i32, i32
  }
  func.func @transform_1(%arg0: i32, %arg1: i32) -> (i32, i32, i32) {
    %c0_i32 = arith.constant 0 : i32
    %c0_i32_0 = arith.constant 0 : i32
    return %arg0, %c0_i32, %arg1 : i32, i32, i32
  }
  func.func @transform_2(%arg0: i32, %arg1: i32) -> (i32, i32) {
    %c0_i32 = arith.constant 0 : i32
    %c0_i32_0 = arith.constant 0 : i32
    %c0_i32_1 = arith.constant 0 : i32
    return %c0_i32, %c0_i32_0 : i32, i32
  }
  func.func @transform_3(%arg0: i32, %arg1: i32) -> (i32, i32, i32) {
    %c0_i32 = arith.constant 0 : i32
    %c0_i32_0 = arith.constant 0 : i32
    %c0_i32_1 = arith.constant 0 : i32
    return %arg0, %c0_i32, %c0_i32_0 : i32, i32, i32
  }
  func.func @transform_4(%arg0: i32, %arg1: i32) -> (i32, i32, i32) {
    %c0_i32 = arith.constant 0 : i32
    %c0_i32_0 = arith.constant 0 : i32
    %c0_i32_1 = arith.constant 0 : i32
    return %arg0, %c0_i32, %c0_i32_0 : i32, i32, i32
  }
}

</mosaic_0001>

<bundles_post_ra>
// kernel: tpu_custom_call.1
= control target key start
LH: loop header
LB: loop body
LE: loop exit
PB: predicated region body
PF: predicated region fallthrough
CT: control target
= control target key end

     0   :  { %10 = vsyncpa [#allocation3], 0  ;;  %s1273_s0 = inlined_call_operand.hbm [shape: f32[2,4,256], index: 0, kind: input, shape index: {}]   ;;  %s1274_s1 = inlined_call_operand.hbm [shape: s32[2,1,256], index: 1, kind: input, shape index: {}]   ;;  %s1275_s2 = inlined_call_operand.vmem [shape: f32[1,4], index: 2, kind: input, shape index: {}]   ;;  %s1276_s3 = inlined_call_operand.hbm [shape: f32[2,1,256], index: 3, kind: output, shape index: {0}]   ;;  %s1277_s4 = inlined_call_operand.hbm [shape: f32[2,1,256], index: 4, kind: output, shape index: {1}]  }
   0x1   :  { %12 = vsyncpa [#allocation3 + $0x1], 0 }
   0x2   :  { %13 = vsyncpa [#allocation6], 0 }
   0x3   :  { %15 = vsyncpa [#allocation6 + $0x1], 0 }
   0x4   :  { %16 = vsyncpa [#allocation4], 0 }
   0x5   :  { %18 = vsyncpa [#allocation4 + $0x1], 0 }
   0x6   :  { %19 = vsyncpa [#allocation9], 0 }
   0x7   :  { %21 = vsyncpa [#allocation9 + $0x1], 0  ;;  %s1044_s15 = smov 0   ;;  %s1046_s16 = smov 0  }
   0x8   :  { %s1048_s17 = smov 0   ;;  %s1050_s18 = smov 0  }
   0x9   :  { %s1052_s19 = smov 0   ;;  %s1054_s20 = smov 0  }
   0xa LB: > { %s720_s21 = sadd.s32 4294967295, %s1014_s20   ;;  %s721_s22 = sadd.s32 4294967294, %s1014_s20   ;;  %s1014_s20 = sphi %s1054_s20, %s27_s20   ;;  %s1010_s19 = sphi %s1052_s19, %s1293_s19   ;;  %s1006_s18 = sphi %s1050_s18, %s1292_s18   ;;  %s1002_s17 = sphi %s1048_s17, %s1291_s17   ;;  %s998_s16 = sphi %s1046_s16, %s1290_s16   ;;  %s994_s15 = sphi %s1044_s15, %s1289_s15  }
   0xb   : > { %s39_s23 = sadd.s32 1, %s1010_s19  ;;  %s48_s24 = sadd.s32 1, %s1002_s17 }
   0xc   : > { %p41_p0 = scmp.ge.s32.totalorder %s39_s23, 2  ;;  %p55_p1 = scmp.ne.s32.totalorder %s1002_s17, %s998_s16 }
   0xd   : > { %p56_p2 = scmp.eq.s32.totalorder %s1014_s20, 0  ;;  %p61_p3 = scmp.ne.s32.totalorder %s998_s16, %s994_s15 }
   0xe   : > { %s1295_s23 = smov (%p41_p0, %s39_s23), 0  ;;  %p62_p5 = scmp.eq.s32.totalorder %s720_s21, 0 }
   0xf   : > { %p1085_p4 = por %p56_p2, %p55_p1  ;;  %s43_s26 = ssub.s32 %s1010_s19, %s1295_s23 }
  0x10   : > { %p134_p6 = scmp.eq.s32.totalorder %s720_s21, 1  ;;  %p46_p7 = scmp.eq.s32.totalorder %s43_s26, 0 }
  0x11   : > { %p1091_p8 = por %p62_p5, %p61_p3  ;;  %p140_p10 = scmp.eq.s32.totalorder %s721_s22, 1 }
  0x12   : > { %p1095_p9 = por %p134_p6, %p55_p1  ;;  %p723_p12 = scmp.ge.s32.totalorder %s1014_s20, 2 }
  0x13   : > { %s1100_s29 = scalar_select %p46_p7, %s1002_s17, %s48_s24  }
  0x14   : > { %p1102_p11 = por %p140_p10, %p61_p3  ;;  %p777_p13 = scmp.lt.s32.totalorder %s1014_s20, 2 }
  0x15   : > { %s189_s5 = sand.u32 1, %s1002_s17   ;;  %s754_s7 = sshll.u32 %s1010_s19, 3 }
  0x16   : > { %s724_s6 = sshll.u32 %s189_s5, 3  ;;  %s200_s10 = scalar_lea.hbm %s1273_s0, %s754_s7 }
  0x17   : > { %s193_s11 = scalar_lea.vmem [#allocation2], %s724_s6  ;;  %s202_s13 = sshll.u32 %s200_s10, 4  ;;  %s203_s13 = int_to_ptr.hbm [resolvable:$true] %s202_s13 }
  0x18   : > { %s204_s12 = sshll.u32 %s193_s11, 4  ;;  %p1115_p0 = pnand %p777_p13, %p1085_p4  ;;  %s205_s12 = int_to_ptr.vmem [resolvable:$true] %s204_s12 }
  0x19   : > { %p729_p1 = scmp.ge.s32.totalorder %s1014_s20, 1  ;;  %p230_p2 = scmp.lt.s32.totalorder %s1014_s20, 3 }
  0x1a   : > { %s190_s21 = scalar_lea.sflag [#allocation3], %s189_s5  ;;  %s727_s22 = sshll.u32 %s189_s5, 1 }
  0x1b   : > { %766 = dma.hbm_to_vmem [thread:$0]  (!%p1115_p0), %s203_s13, 128, %s205_s12, %s190_s21  }
  0x1c   : > { %p231_p3 = pnand %p729_p1, %p230_p2  ;;  %s728_s24 = sshll.u32 %s1010_s19, 1 }
  0x1d   : > { %s221_s7 = scalar_lea.hbm %s1274_s1, %s728_s24  ;;  %s215_s8 = scalar_lea.vmem [#allocation5], %s727_s22 }
  0x1e   : > { %s225_s25 = sshll.u32 %s215_s8, 4  ;;  %s223_s9 = sshll.u32 %s221_s7, 4  ;;  %s226_s25 = int_to_ptr.vmem [resolvable:$true] %s225_s25  ;;  %s224_s9 = int_to_ptr.hbm [resolvable:$true] %s223_s9 }
  0x1f   : > { %s212_s10 = scalar_lea.sflag [#allocation6], %s189_s5  ;;  %234 = sbr.rel (%p231_p3) target bundleno = 243 (0xf3), region = 32 }
  0x20   : > { %769 = dma.hbm_to_vmem [thread:$0]  (!%p1115_p0), %s224_s9, 32, %s226_s25, %s212_s10  }
  0x21   : > { %s1130_s11 = sand.u32 (!%p231_p3), 1, %s998_s16  }
  0x22   : > { %s730_s12 = sshll.u32 (!%p231_p3), %s1130_s11, 3  ;;  %s237_s13 = scalar_lea.sflag (!%p231_p3), [#allocation3], %s1130_s11 }
  0x23   : > { %s240_s21 = scalar_lea.vmem (!%p231_p3), [#allocation2], %s730_s12 }
  0x24   : > { %977 = dma.done.wait (%p1091_p8), %s237_s13, 128  }
  0x25   : > { %979 = vsyncadd (%p1091_p8), %s237_s13, 4294967168  ;;  %s1139_s5 = sshll.u32 %s1130_s11, 1  ;;  %s247_s14 = scalar_lea.sflag [#allocation6], %s1130_s11 }
  0x26   : > { %s250_s22 = scalar_lea.vmem [#allocation5], %s1139_s5 }
  0x27   : > { %981 = dma.done.wait (%p1091_p8), %s247_s14, 32  }
  0x28   : > { %983 = vsyncadd (%p1091_p8), %s247_s14, 4294967264  ;;  %v298_v0 = vld [vmem:[%s240_s21] sm:$0xff]  ;;  %vm323_vm0 = vcmask 1043456   ;;  %v292_v21 = vlaneseq  ;;  %v299_v23 = vld [vmem:[%s250_s22] sm:$0x3]  ;;  %vm360_vm1 = vcmask 31744  }
  0x29   : > { %318 = vst [vmem:[#allocation1] ss:$2 sm:$0xff] %v298_v0  ;;  %v349_v25 = vperm.slane %v299_v23, 1  ;;  %v348_v26 = vperm.slane %v299_v23, 0  ;;  %v1016_v29 = vmov 1.0   ;;  %v1017_v30 = vmov 0.0  }
  0x2a   : > { %v347_v24 = vshrl.u32 %v292_v21, 7  ;;  %v461_v33 = vld [vmem:[%s1275_s2] sm:$0x1]  ;;  %vm1167_vm4 = vcmp.lt.s32.totalorder %v292_v21, 256  ;;  %s1176_s26 = scalar_lea.vmem [#allocation8], %s1139_s5  ;;  %s1182_s6 = scalar_lea.vmem [#allocation7], %s1139_s5 }
  0x2b   : > { %297 = vst.msk [vmem:[%s1176_s26] sm:$0x3] %vm1167_vm4, %v1017_v30  ;;  %vm309_vm5 = vcmp.ne.s32.totalorder %v299_v23, 255  ;;  %v1018_v39 = vmov 0   ;;  %s750_s7 = sshll.u32 %s1006_s18, 1  ;;  %vm529_vm8 = vcmask 1040384  }
  0x2c   : > { %vm351_vm2 = vcmp.eq.s32.totalorder %v347_v24, %v349_v25  ;;  %vm350_vm3 = vcmp.eq.s32.totalorder %v347_v24, %v348_v26  ;;  %296 = vst.msk [vmem:[%s1182_s6] sm:$0x3] %vm1167_vm4, %v1017_v30  ;;  %v310_v40 = vsel %vm309_vm5, 1, %v1018_v39  ;;  %s576_s9 = scalar_lea.hbm %s1277_s4, %s750_s7  ;;  %s578_s10 = sshll.u32 %s1176_s26, 4  ;;  %s579_s10 = int_to_ptr.vmem [resolvable:$true] %s578_s10 }
  0x2d   : > { %v735_v31 = vsel %vm351_vm2, 1.0, %v1017_v30  ;;  %v734_v32 = vsel %vm350_vm3, 1.0, %v1017_v30  ;;  %v312_v43 = vperm.slane %v310_v40, 1  ;;  %v311_v44 = vperm.slane %v310_v40, 0  ;;  %s580_s12 = sshll.u32 %s576_s9, 4  ;;  %s552_s13 = scalar_lea.sflag [#allocation9], %s1130_s11  ;;  %s581_s12 = int_to_ptr.hbm [resolvable:$true] %s580_s12 }
  0x2e   : > { %s910_s21 = sshra.s32 %s581_s12, 4  ;;  %s916_s27 = scalar_lea.hbm %s1277_s4, 4  ;;  %s911_s21 = int_to_ptr.hbm [resolvable:$true] %s910_s21 }
  0x2f   : > { %vm1188_vm6 = vcmp.ne.s32.totalorder %v312_v43, 0  ;;  %vm1192_vm7 = vcmp.ne.s32.totalorder %v311_v44, 0  ;;  %s912_s5 = scalar_lea.hbm %s911_s21, 2  ;;  %p917_p7 = scmp.lt.s32.totalorder %s911_s21, %s1277_s4 }
  0x30   : > { %v319_v1 = vld.sshfl [vmem:[#allocation1] sm:$0xff pattern:$0x75316420]  ;;  %v320_v2 = vld.sshfl [vmem:[#allocation1 + $0x8] sm:$0xff pattern:$0x75316420]  ;;  %p913_p4 = scmp.ne.s32.totalorder %s911_s21, %s912_s5  ;;  %p918_p8 = scmp.lt.s32.totalorder %s916_s27, %s912_s5 }
  0x31   : > { %v324_v3 = vsel %vm323_vm0, %v319_v1, -inf  ;;  %v331_v4 = vsel %vm323_vm0, %v320_v2, -inf }
  0x32   : > { %v325_v5 = vrot.slane %v324_v3, 4  ;;  %v332_v6 = vrot.slane %v331_v4, 4  ;;  %v538_v56 = vld [vmem:[%s1176_s26] sm:$0x3]  ;;  %p914_p5 = pnand %p913_p4, %p1095_p9  ;;  %p919_p10 = por %p918_p8, %p917_p7 }
  0x34   : > { %v326_v7 = vmax.f32 %v324_v3, %v325_v5  ;;  %v333_v8 = vmax.f32 %v331_v4, %v332_v6  ;;  %p915_p6 = pneg %p914_p5 }
  0x36   : > { %v327_v9 = vrot.slane %v326_v7, 2  ;;  %v334_v10 = vrot.slane %v333_v8, 2  ;;  %p920_p13 = pnand %p919_p10, %p915_p6 }
  0x38   : > { %v328_v11 = vmax.f32 %v326_v7, %v327_v9  ;;  %v335_v12 = vmax.f32 %v333_v8, %v334_v10 }
  0x3a   : > { %v329_v13 = vrot.slane %v328_v11, 1  ;;  %v336_v14 = vrot.slane %v335_v12, 1 }
  0x3c   : > { %v1149_v15 = vmax.f32 %v328_v11, %v329_v13  ;;  %v1151_v16 = vmax.f32 %v335_v12, %v336_v14 }
  0x3e   : > { %v340_v17 = vrot.slane %v1151_v16, 4 }
  0x40   : > { %v341_v18 = vsel %vm323_vm0, %v1149_v15, %v340_v17 }
  0x41   : > { %v343_v19 = vsub.f32 %v298_v0, %v341_v18 }
  0x43   : > { %v344_v20 = vmul.f32 1.442695, %v343_v19 }
  0x45   : > { %830 = vpow2.f32 %v344_v20 }
  0x4b   : > { %v831_v22 = vpop.eup %830 }
  0x4c   : > { %357 = vst [vmem:[#allocation1] ss:$2 sm:$0xff] %v831_v22 }
  0x53   : > { %v359_v27 = vld.sshfl [vmem:[#allocation1 + $0x8] sm:$0xff pattern:$0x75316420]  ;;  %v358_v28 = vld.sshfl [vmem:[#allocation1] sm:$0xff pattern:$0x75316420] }
  0x54   : > { %738 = vmatpush.msk.msra.mxu1 %vm323_vm0, %v359_v27  ;;  %736 = vmatpush.msk.msra.mxu0 %vm323_vm0, %v358_v28  ;;  %408 = vst [vmem:[#allocation1] ss:$2 sm:$0xff] %v298_v0 }
  0x55   : > { %739 = vmatmul.msk.f32.vlgmr.msra.gmra.mxu1 %vm360_vm1, %v1016_v29  ;;  %737 = vmatmul.msk.f32.vlgmr.msra.gmra.mxu0 %vm360_vm1, %v1016_v29 }
  0x56   : > { %746 = vmatpush.msk.msrb.mxu1 %vm323_vm0, %v735_v31  ;;  %744 = vmatpush.msk.msrb.mxu0 %vm323_vm0, %v734_v32 }
  0x5b   : > { %v410_v34 = vld.sshfl [vmem:[#allocation1 + $0x8] sm:$0xff pattern:$0x75316420]  ;;  %v409_v35 = vld.sshfl [vmem:[#allocation1] sm:$0xff pattern:$0x75316420] }
  0x5c   : > { %v414_v36 = vmul.f32 %v735_v31, %v410_v34  ;;  %v413_v37 = vmul.f32 %v734_v32, %v409_v35 }
  0x5d   : > { %747 = vmatmul.msk.f32.vlgmr.msrb.gmra.mxu1 %vm360_vm1, %v461_v33  ;;  %745 = vmatmul.msk.f32.vlgmr.msrb.gmra.mxu0 %vm360_vm1, %v461_v33 }
  0x5e   : > { %742 = vmatpush.msk.msra.mxu3 %vm323_vm0, %v414_v36  ;;  %740 = vmatpush.msk.msra.mxu2 %vm323_vm0, %v413_v37 }
  0x5f   : > { %743 = vmatmul.msk.f32.vlgmr.msra.gmra.mxu3 %vm360_vm1, %v1016_v29  ;;  %741 = vmatmul.msk.f32.vlgmr.msra.gmra.mxu2 %vm360_vm1, %v1016_v29 }
  0xd2   : > { %v405_v41 = vpop.f32.mrf.mxu1  ;;  %v385_v42 = vpop.f32.mrf.mxu0 }
  0xd3   : > { %832 = vlog2.f32 %v405_v41 }
  0xd4   : > { %834 = vlog2.f32 %v385_v42 }
  0xd9   : > { %v833_v47 = vpop.eup %832 }
  0xda   : > { %v835_v48 = vpop.eup %834  ;;  %v508_v49 = vpop.f32.mrf.mxu1  ;;  %v514_v51 = vmul.f32 0.6931472, %v833_v47 }
  0xdb   : > { %v488_v50 = vpop.f32.mrf.mxu0  ;;  %v512_v52 = vmul.f32 0.6931472, %v835_v48  ;;  %v520_v53 = vsel %vm1188_vm6, %v508_v49, 0.0 }
  0xdc   : > { %v519_v54 = vsel %vm1192_vm7, %v488_v50, 0.0  ;;  %v541_v55 = vrot.slane %v520_v53, 7  ;;  %v516_v58 = vadd.f32 %v514_v51, %v1151_v16 }
  0xdd   : > { %v515_v59 = vadd.f32 %v512_v52, %v1149_v15 }
  0xde   : > { %v542_v57 = vsel %vm529_vm8, %v519_v54, %v541_v55 }
  0xdf   : > { %v544_v60 = vadd.f32 %v542_v57, %v538_v56 }
  0xe1   : > { %545 = vst.msk [vmem:[%s1176_s26] sm:$0x3] %vm1167_vm4, %v544_v60 }
  0xe2   : > { %v458_v61 = vpop.f32.mrf.mxu3  ;;  %v438_v62 = vpop.f32.mrf.mxu2 }
  0xe3   : > { %923 = shalt.err (!%p920_p13)
}
  0xe4   : > { %760 = dma.vmem_to_hbm [thread:$0]  (%p1095_p9), %s579_s10, 32, %s581_s12, %s552_s13   ;;  %v518_v63 = vsub.f32 %v516_v58, %v458_v61  ;;  %v517_v0 = vsub.f32 %v515_v59, %v438_v62  ;;  %v523_v6 = vld [vmem:[%s1182_s6] sm:$0x3] }
  0xe5   : > { %s562_s9 = scalar_lea.hbm %s1276_s3, %s750_s7  ;;  %s564_s10 = sshll.u32 %s1182_s6, 4  ;;  %s565_s10 = int_to_ptr.vmem [resolvable:$true] %s564_s10 }
  0xe6   : > { %v522_v1 = vsel %vm1188_vm6, %v518_v63, 0.0  ;;  %v521_v2 = vsel %vm1192_vm7, %v517_v0, 0.0  ;;  %s566_s12 = sshll.u32 %s562_s9, 4  ;;  %s547_s18 = scalar_lea.sflag [#allocation4], %s1130_s11  ;;  %s567_s12 = int_to_ptr.hbm [resolvable:$true] %s566_s12 }
  0xe7   : > { %v525_v3 = vmul.f32 %v522_v1, %v520_v53  ;;  %v524_v4 = vmul.f32 %v521_v2, %v519_v54  ;;  %s938_s13 = sshra.s32 %s567_s12, 4  ;;  %s944_s14 = scalar_lea.hbm %s1276_s3, 4  ;;  %s939_s13 = int_to_ptr.hbm [resolvable:$true] %s938_s13 }
  0xe8   : > { %s940_s21 = scalar_lea.hbm %s939_s13, 2  ;;  %p945_p3 = scmp.lt.s32.totalorder %s939_s13, %s1276_s3 }
  0xe9   : > { %v528_v5 = vrot.slane %v525_v3, 7  ;;  %p941_p0 = scmp.ne.s32.totalorder %s939_s13, %s940_s21  ;;  %p946_p4 = scmp.lt.s32.totalorder %s944_s14, %s940_s21 }
  0xeb   : > { %v530_v7 = vsel %vm529_vm8, %v524_v4, %v528_v5  ;;  %p942_p1 = pnand %p941_p0, %p1095_p9  ;;  %p947_p5 = por %p946_p4, %p945_p3 }
  0xec   : > { %v532_v8 = vadd.f32 %v530_v7, %v523_v6 }
  0xed   : > { %p943_p2 = pneg %p942_p1 }
  0xee   : > { %537 = vst.msk [vmem:[%s1182_s6] sm:$0x3] %vm1167_vm4, %v532_v8 }
  0xef   : > { %p948_p6 = pnand %p947_p5, %p943_p2 }
  0xf1   : > { %951 = shalt.err (!%p948_p6)
}
  0xf2   : > { %759 = dma.vmem_to_hbm [thread:$0]  (%p1095_p9), %s565_s10, 32, %s567_s12, %s547_s18  }
  0xf3 PF: > { %s592_s11 = sand.u32 1, %s994_s15   ;;  %p771_p7 = pnand %p723_p12, %p1102_p11 }
  0xf4   : > { %s593_s6 = scalar_lea.sflag [#allocation4], %s592_s11 }
  0xf5   : > { %p772_p8 = pneg %p771_p7 }
  0xf7   : > { %985 = dma.done.wait (%p772_p8), %s593_s6, 32  }
  0xf8   : > { %987 = vsyncadd (%p772_p8), %s593_s6, 4294967264  ;;  %s603_s24 = scalar_lea.sflag [#allocation9], %s592_s11 }
  0xf9   : > { %989 = dma.done.wait (%p772_p8), %s603_s24, 32  }
  0xfa   : > { %991 = vsyncadd (%p772_p8), %s603_s24, 4294967264  ;;  %s27_s20 = sadd.s32 1, %s1014_s20   ;;  %s1289_s15 = smov %s998_s16 }
  0xfb   : > { %p24_p10 = scmp.ge.s32.totalorder %s27_s20, 4   ;;  %s1290_s16 = smov %s1002_s17 }
  0xfc   : > { %s1291_s17 = smov %s1100_s29  ;;  %s1292_s18 = smov %s1010_s19 }
  0xfd   : > { %s1293_s19 = smov %s1295_s23  ;;  %26 = sbr.rel (!%p24_p10) target bundleno = 10 (0xa), region = 111 }
 0x102   :  { %609 = vsyncpa [#allocation3], 1 }
 0x103   :  { %611 = vsyncpa [#allocation3 + $0x1], 1 }
 0x104   :  { %612 = vsyncpa [#allocation6], 1 }
 0x105   :  { %614 = vsyncpa [#allocation6 + $0x1], 1 }
 0x106   :  { %615 = vsyncpa [#allocation4], 1 }
 0x107   :  { %617 = vsyncpa [#allocation4 + $0x1], 1 }
 0x108   :  { %618 = vsyncpa [#allocation9], 1 }
 0x109   :  { %620 = vsyncpa [#allocation9 + $0x1], 1 }

</bundles_post_ra>
